<compile_context>
chip_gen: v7x
topology: tpu7x:2x2x1
jax: 0.10.0
libtpu: 0.0.40
codegen_flags: <defaults>
</compile_context>

<pallas_src>
import functools

import jax
import jax.numpy as jnp
from jax.experimental import pallas as pl
from jax.experimental.pallas import tpu as pltpu

NUM_CLASSES = 10
IN_FEATURES = 28 * 28       # 784
HIDDEN = 64
HIDDEN_PAD = 128            # lane-dense hidden width
OUT_PAD = 128               # lane-dense padded output width
NEG_INF = -1e30             # self-masking bias for padded fc4 columns


def _mlp_kernel(x_ref,
                w1_ref, b1_ref,
                w2_ref, b2_ref,
                w3_ref, b3_ref,
                w4_ref, b4_ref,
                o_ref):
    # Compute/streaming dtype for MXU inputs (bf16 by default, or f32).
    cdt = w1_ref.dtype

    # Per-tile cast (avoids a wrapper-side HBM cast pass over the whole x).
    x = x_ref[...].astype(cdt)

    # fc1 + relu  (bias add / relu in f32, MXU accumulates in f32)
    h = jnp.dot(x, w1_ref[...], preferred_element_type=jnp.float32) + b1_ref[...]
    h = jnp.maximum(h, 0.0).astype(cdt)

    # fc2 + relu
    h = jnp.dot(h, w2_ref[...], preferred_element_type=jnp.float32) + b2_ref[...]
    h = jnp.maximum(h, 0.0).astype(cdt)

    # fc3 + relu
    h = jnp.dot(h, w3_ref[...], preferred_element_type=jnp.float32) + b3_ref[...]
    h = jnp.maximum(h, 0.0).astype(cdt)

    # fc4 (padded to 128 output lanes; padded columns carry a -1e30 bias)
    logits = jnp.dot(h, w4_ref[...], preferred_element_type=jnp.float32) + b4_ref[...]

    # log_softmax: padded columns self-mask (exp(-1e30 - m) == 0), so no
    # iota / where masking is needed.  Padded columns are sliced off outside.
    m = jnp.max(logits, axis=-1, keepdims=True)
    e = jnp.exp(logits - m)
    lse = jnp.log(jnp.sum(e, axis=-1, keepdims=True))
    o_ref[...] = (logits - m - lse).astype(o_ref.dtype)


def _round_up(n, m):
    return ((n + m - 1) // m) * m


@functools.partial(jax.jit, static_argnames=("block_b", "stream_dtype"))
def mlp_forward(x, params, *, block_b=1024, stream_dtype=jnp.bfloat16):
    """x: (B, 784) float32 or bfloat16. params: (in, out) weights + (1, out) biases.

    Returns (B, 10) float32 log-probabilities (matches torch module semantics).
    """
    B, F = x.shape
    assert F == IN_FEATURES

    # ---- batch tile selection (8-aligned; no padding of x itself) ----------
    TB = max(8, (min(block_b, _round_up(B, 8)) // 8) * 8)
    # v7x: guarantee >= 2 batch blocks so the "parallel" grid axis can shard
    # across both TensorCores (cheap: resident weights just replicate per-TC).
    if B >= 16 and TB >= B:
        TB = max(8, _round_up((B + 1) // 2, 8))
        if TB >= B:
            TB = max(8, TB - 8)
    num_blocks = pl.cdiv(B, TB)
    grid = (num_blocks,)

    # ---- params: pad hidden dims to 128 lanes, cast to streaming dtype -----
    sd = jnp.dtype(stream_dtype)

    def pad2(a, rows, cols, value=0.0):
        r, c = a.shape
        return jnp.pad(a, ((0, rows - r), (0, cols - c)), constant_values=value)

    w1 = pad2(params["w1"], IN_FEATURES, HIDDEN_PAD).astype(sd)
    w2 = pad2(params["w2"], HIDDEN_PAD, HIDDEN_PAD).astype(sd)
    w3 = pad2(params["w3"], HIDDEN_PAD, HIDDEN_PAD).astype(sd)
    w4 = pad2(params["w4"], HIDDEN_PAD, OUT_PAD).astype(sd)
    b1 = pad2(params["b1"], 1, HIDDEN_PAD).astype(jnp.float32)
    b2 = pad2(params["b2"], 1, HIDDEN_PAD).astype(jnp.float32)
    b3 = pad2(params["b3"], 1, HIDDEN_PAD).astype(jnp.float32)
    b4 = pad2(params["b4"], 1, OUT_PAD, value=NEG_INF).astype(jnp.float32)

    def resident_spec(a):
        # Constant index_map -> weight/bias block stays VMEM-resident.
        return pl.BlockSpec(a.shape, lambda i: (0, 0))

    in_specs = [
        pl.BlockSpec((TB, IN_FEATURES), lambda i: (i, 0)),   # streamed x tiles
        resident_spec(w1), resident_spec(b1),
        resident_spec(w2), resident_spec(b2),
        resident_spec(w3), resident_spec(b3),
        resident_spec(w4), resident_spec(b4),
    ]
    out_specs = pl.BlockSpec((TB, OUT_PAD), lambda i: (i, 0))
    out_shape = jax.ShapeDtypeStruct((B, OUT_PAD), jnp.float32)

    rows = num_blocks * TB
    weight_bytes = sum(int(a.size) * a.dtype.itemsize
                       for a in (w1, b1, w2, b2, w3, b3, w4, b4))
    cost = pl.CostEstimate(
        flops=2 * rows * (IN_FEATURES * HIDDEN_PAD
                          + HIDDEN_PAD * HIDDEN_PAD
                          + HIDDEN_PAD * HIDDEN_PAD
                          + HIDDEN_PAD * OUT_PAD),
        transcendentals=rows * (OUT_PAD + 1),   # exp over 128 lanes + log/row
        bytes_accessed=(rows * IN_FEATURES * x.dtype.itemsize
                        + rows * OUT_PAD * 4 + weight_bytes),
    )

    out_padded = pl.pallas_call(
        _mlp_kernel,
        out_shape=out_shape,
        grid=grid,
        in_specs=in_specs,
        out_specs=out_specs,
        compiler_params=pltpu.CompilerParams(
            dimension_semantics=("parallel",)),
        cost_estimate=cost,
    )(x, w1, b1, w2, b2, w3, b3, w4, b4)

    # TODO(synk): for bandwidth-critical callers, return the padded (B, 128)
    # array and slice lazily at the consumer to avoid an extra HBM pass.
    return out_padded[:, :NUM_CLASSES]


def init_params(key):
    """Deterministic init mirroring torch.nn.Linear shapes.

    torch weight is (out, in); we store the transpose (in, out).
    Uniform(-1/sqrt(fan_in), 1/sqrt(fan_in)) like torch's default.
    """
    dims = [(IN_FEATURES, HIDDEN), (HIDDEN, HIDDEN),
            (HIDDEN, HIDDEN), (HIDDEN, NUM_CLASSES)]
    params = {}
    keys = jax.random.split(key, 2 * len(dims))
    for i, (fan_in, fan_out) in enumerate(dims):
        bound = 1.0 / (fan_in ** 0.5)
        w = jax.random.uniform(keys[2 * i], (fan_in, fan_out),
                               minval=-bound, maxval=bound, dtype=jnp.float32)
        b = jax.random.uniform(keys[2 * i + 1], (1, fan_out),
                               minval=-bound, maxval=bound, dtype=jnp.float32)
        params[f"w{i + 1}"] = w
        params[f"b{i + 1}"] = b
    return params


def reference_forward(x, params):
    h = jnp.maximum(x @ params["w1"] + params["b1"], 0.0)
    h = jnp.maximum(h @ params["w2"] + params["b2"], 0.0)
    h = jnp.maximum(h @ params["w3"] + params["b3"], 0.0)
    logits = h @ params["w4"] + params["b4"]
    return jax.nn.log_softmax(logits, axis=1)


if __name__ == "__main__":
    key = jax.random.PRNGKey(0)
    pkey, xkey = jax.random.split(key)

    params = init_params(pkey)
    # Small batch of flattened 28x28 "images".
    x = jax.random.normal(xkey, (8, IN_FEATURES), dtype=jnp.float32)
    ref = reference_forward(x, params)

    # f32 compute path: tight tolerance.
    out_f32 = jax.block_until_ready(
        mlp_forward(x, params, stream_dtype=jnp.float32))
    assert out_f32.shape == (8, NUM_CLASSES)
    assert jnp.allclose(out_f32, ref, atol=1e-5, rtol=1e-5), "f32 mismatch vs reference"

    # Default bf16 compute path (per-tile in-kernel cast of f32 x): loose tolerance.
    out_bf16 = jax.block_until_ready(mlp_forward(x, params))
    assert out_bf16.shape == (8, NUM_CLASSES)
    assert jnp.allclose(out_bf16, ref, atol=5e-2, rtol=5e-2), "bf16 mismatch vs reference"

    # bf16 x streamed directly from HBM (halves x bytes on a mem-bound kernel).
    out_bf16_x = jax.block_until_ready(
        mlp_forward(x.astype(jnp.bfloat16), params))
    assert out_bf16_x.shape == (8, NUM_CLASSES)
    assert jnp.allclose(out_bf16_x, ref, atol=5e-2, rtol=5e-2), "bf16-x mismatch vs reference"

    # Multi-block / ragged-edge path (B=24 -> two batch tiles, last one partial).
    x_big = jax.random.normal(xkey, (24, IN_FEATURES), dtype=jnp.float32)
    ref_big = reference_forward(x_big, params)
    out_big = jax.block_until_ready(
        mlp_forward(x_big, params, stream_dtype=jnp.float32))
    assert out_big.shape == (24, NUM_CLASSES)
    assert jnp.allclose(out_big, ref_big, atol=1e-5, rtol=1e-5), "multi-block mismatch"

    print("KERNEL_OK")
</pallas_src>

<mosaic_0001>
module attributes {stable_mosaic.version = 11 : i64} {
  func.func @_mlp_kernel(%arg0: i32, %arg1: memref<8x784xf32, #tpu.memory_space<vmem>>, %arg2: memref<784x128xf32, #tpu.memory_space<vmem>>, %arg3: memref<1x128xf32, #tpu.memory_space<vmem>>, %arg4: memref<128x128xf32, #tpu.memory_space<vmem>>, %arg5: memref<1x128xf32, #tpu.memory_space<vmem>>, %arg6: memref<128x128xf32, #tpu.memory_space<vmem>>, %arg7: memref<1x128xf32, #tpu.memory_space<vmem>>, %arg8: memref<128x128xf32, #tpu.memory_space<vmem>>, %arg9: memref<1x128xf32, #tpu.memory_space<vmem>>, %arg10: memref<8x128xf32, #tpu.memory_space<vmem>>) attributes {dimension_semantics = [#tpu.dimension_semantics<parallel>], iteration_bounds = array<i64: 1>, scalar_prefetch = 0 : i64, scratch_operands = 0 : i64, tpu.core_type = #tpu.core_type<tc>, window_params = [{transform_indices = @transform_0, window_bounds = array<i64: 8, 784>}, {pipeline_mode = #tpu.pipeline_mode<synchronous>, transform_indices = @transform_1, window_bounds = array<i64: 784, 128>}, {pipeline_mode = #tpu.pipeline_mode<synchronous>, transform_indices = @transform_2, window_bounds = array<i64: 1, 128>}, {pipeline_mode = #tpu.pipeline_mode<synchronous>, transform_indices = @transform_3, window_bounds = array<i64: 128, 128>}, {pipeline_mode = #tpu.pipeline_mode<synchronous>, transform_indices = @transform_4, window_bounds = array<i64: 1, 128>}, {pipeline_mode = #tpu.pipeline_mode<synchronous>, transform_indices = @transform_5, window_bounds = array<i64: 128, 128>}, {pipeline_mode = #tpu.pipeline_mode<synchronous>, transform_indices = @transform_6, window_bounds = array<i64: 1, 128>}, {pipeline_mode = #tpu.pipeline_mode<synchronous>, transform_indices = @transform_7, window_bounds = array<i64: 128, 128>}, {pipeline_mode = #tpu.pipeline_mode<synchronous>, transform_indices = @transform_8, window_bounds = array<i64: 1, 128>}, {transform_indices = @transform_9, window_bounds = array<i64: 8, 128>}]} {
    %c0 = arith.constant 0 : index
    %c0_0 = arith.constant 0 : index
    %0 = vector.load %arg1[%c0, %c0_0] : memref<8x784xf32, #tpu.memory_space<vmem>>, vector<8x784xf32>
    %c0_1 = arith.constant 0 : index
    %c0_2 = arith.constant 0 : index
    %1 = vector.load %arg2[%c0_1, %c0_2] : memref<784x128xf32, #tpu.memory_space<vmem>>, vector<784x128xf32>
    %cst = arith.constant dense<0.000000e+00> : vector<8x128xf32>
    %2 = tpu.matmul %0, %1, %cst {dimension_numbers = #tpu.dot_dimension_numbers<[1], [0], [0], [1], [0, 0, 1, 1], [], []>} : vector<8x784xf32>, vector<784x128xf32>, vector<8x128xf32> -> vector<8x128xf32>
    %c0_3 = arith.constant 0 : index
    %c0_4 = arith.constant 0 : index
    %3 = vector.load %arg3[%c0_3, %c0_4] : memref<1x128xf32, #tpu.memory_space<vmem>>, vector<1x128xf32>
    %4 = vector.broadcast %3 : vector<1x128xf32> to vector<8x128xf32>
    %5 = arith.addf %2, %4 : vector<8x128xf32>
    %cst_5 = arith.constant 0.000000e+00 : f32
    %6 = vector.broadcast %cst_5 : f32 to vector<8x128xf32>
    %7 = arith.maximumf %5, %6 : vector<8x128xf32>
    %c0_6 = arith.constant 0 : index
    %c0_7 = arith.constant 0 : index
    %8 = vector.load %arg4[%c0_6, %c0_7] : memref<128x128xf32, #tpu.memory_space<vmem>>, vector<128x128xf32>
    %cst_8 = arith.constant dense<0.000000e+00> : vector<8x128xf32>
    %9 = tpu.matmul %7, %8, %cst_8 {dimension_numbers = #tpu.dot_dimension_numbers<[1], [0], [0], [1], [0, 0, 1, 1], [], []>} : vector<8x128xf32>, vector<128x128xf32>, vector<8x128xf32> -> vector<8x128xf32>
    %c0_9 = arith.constant 0 : index
    %c0_10 = arith.constant 0 : index
    %10 = vector.load %arg5[%c0_9, %c0_10] : memref<1x128xf32, #tpu.memory_space<vmem>>, vector<1x128xf32>
    %11 = vector.broadcast %10 : vector<1x128xf32> to vector<8x128xf32>
    %12 = arith.addf %9, %11 : vector<8x128xf32>
    %cst_11 = arith.constant 0.000000e+00 : f32
    %13 = vector.broadcast %cst_11 : f32 to vector<8x128xf32>
    %14 = arith.maximumf %12, %13 : vector<8x128xf32>
    %c0_12 = arith.constant 0 : index
    %c0_13 = arith.constant 0 : index
    %15 = vector.load %arg6[%c0_12, %c0_13] : memref<128x128xf32, #tpu.memory_space<vmem>>, vector<128x128xf32>
    %cst_14 = arith.constant dense<0.000000e+00> : vector<8x128xf32>
    %16 = tpu.matmul %14, %15, %cst_14 {dimension_numbers = #tpu.dot_dimension_numbers<[1], [0], [0], [1], [0, 0, 1, 1], [], []>} : vector<8x128xf32>, vector<128x128xf32>, vector<8x128xf32> -> vector<8x128xf32>
    %c0_15 = arith.constant 0 : index
    %c0_16 = arith.constant 0 : index
    %17 = vector.load %arg7[%c0_15, %c0_16] : memref<1x128xf32, #tpu.memory_space<vmem>>, vector<1x128xf32>
    %18 = vector.broadcast %17 : vector<1x128xf32> to vector<8x128xf32>
    %19 = arith.addf %16, %18 : vector<8x128xf32>
    %cst_17 = arith.constant 0.000000e+00 : f32
    %20 = vector.broadcast %cst_17 : f32 to vector<8x128xf32>
    %21 = arith.maximumf %19, %20 : vector<8x128xf32>
    %c0_18 = arith.constant 0 : index
    %c0_19 = arith.constant 0 : index
    %22 = vector.load %arg8[%c0_18, %c0_19] : memref<128x128xf32, #tpu.memory_space<vmem>>, vector<128x128xf32>
    %cst_20 = arith.constant dense<0.000000e+00> : vector<8x128xf32>
    %23 = tpu.matmul %21, %22, %cst_20 {dimension_numbers = #tpu.dot_dimension_numbers<[1], [0], [0], [1], [0, 0, 1, 1], [], []>} : vector<8x128xf32>, vector<128x128xf32>, vector<8x128xf32> -> vector<8x128xf32>
    %c0_21 = arith.constant 0 : index
    %c0_22 = arith.constant 0 : index
    %24 = vector.load %arg9[%c0_21, %c0_22] : memref<1x128xf32, #tpu.memory_space<vmem>>, vector<1x128xf32>
    %25 = vector.broadcast %24 : vector<1x128xf32> to vector<8x128xf32>
    %26 = arith.addf %23, %25 : vector<8x128xf32>
    %cst_23 = arith.constant dense<0xFF800000> : vector<8xf32>
    %27 = vector.multi_reduction <maximumf>, %26, %cst_23 [1] : vector<8x128xf32> to vector<8xf32>
    %28 = vector.shape_cast %27 : vector<8xf32> to vector<8x1xf32>
    %29 = vector.broadcast %28 : vector<8x1xf32> to vector<8x128xf32>
    %30 = arith.subf %26, %29 : vector<8x128xf32>
    %31 = math.exp %30 : vector<8x128xf32>
    %cst_24 = arith.constant dense<0.000000e+00> : vector<8xf32>
    %32 = vector.multi_reduction <add>, %31, %cst_24 [1] : vector<8x128xf32> to vector<8xf32>
    %33 = vector.shape_cast %32 : vector<8xf32> to vector<8x1xf32>
    %34 = math.log %33 : vector<8x1xf32>
    %35 = vector.broadcast %28 : vector<8x1xf32> to vector<8x128xf32>
    %36 = arith.subf %26, %35 : vector<8x128xf32>
    %37 = vector.broadcast %34 : vector<8x1xf32> to vector<8x128xf32>
    %38 = arith.subf %36, %37 : vector<8x128xf32>
    %c0_25 = arith.constant 0 : index
    %c0_26 = arith.constant 0 : index
    %39 = vector.load %arg10[%c0_25, %c0_26] : memref<8x128xf32, #tpu.memory_space<vmem>>, vector<8x128xf32>
    tpu.vector_store %arg10[%c0_25, %c0_26], %38 {strides = array<i32>} : memref<8x128xf32, #tpu.memory_space<vmem>>, vector<8x128xf32>,
    return
  }
  func.func @transform_0(%arg0: i32) -> (i32, i32) {
    %c0_i32 = arith.constant 0 : i32
    %c0_i32_0 = arith.constant 0 : i32
    return %arg0, %c0_i32 : i32, i32
  }
  func.func @transform_1(%arg0: i32) -> (i32, i32) {
    %c0_i32 = arith.constant 0 : i32
    %c0_i32_0 = arith.constant 0 : i32
    %c0_i32_1 = arith.constant 0 : i32
    return %c0_i32, %c0_i32_0 : i32, i32
  }
  func.func @transform_2(%arg0: i32) -> (i32, i32) {
    %c0_i32 = arith.constant 0 : i32
    %c0_i32_0 = arith.constant 0 : i32
    %c0_i32_1 = arith.constant 0 : i32
    return %c0_i32, %c0_i32_0 : i32, i32
  }
  func.func @transform_3(%arg0: i32) -> (i32, i32) {
    %c0_i32 = arith.constant 0 : i32
    %c0_i32_0 = arith.constant 0 : i32
    %c0_i32_1 = arith.constant 0 : i32
    return %c0_i32, %c0_i32_0 : i32, i32
  }
  func.func @transform_4(%arg0: i32) -> (i32, i32) {
    %c0_i32 = arith.constant 0 : i32
    %c0_i32_0 = arith.constant 0 : i32
    %c0_i32_1 = arith.constant 0 : i32
    return %c0_i32, %c0_i32_0 : i32, i32
  }
  func.func @transform_5(%arg0: i32) -> (i32, i32) {
    %c0_i32 = arith.constant 0 : i32
    %c0_i32_0 = arith.constant 0 : i32
    %c0_i32_1 = arith.constant 0 : i32
    return %c0_i32, %c0_i32_0 : i32, i32
  }
  func.func @transform_6(%arg0: i32) -> (i32, i32) {
    %c0_i32 = arith.constant 0 : i32
    %c0_i32_0 = arith.constant 0 : i32
    %c0_i32_1 = arith.constant 0 : i32
    return %c0_i32, %c0_i32_0 : i32, i32
  }
  func.func @transform_7(%arg0: i32) -> (i32, i32) {
    %c0_i32 = arith.constant 0 : i32
    %c0_i32_0 = arith.constant 0 : i32
    %c0_i32_1 = arith.constant 0 : i32
    return %c0_i32, %c0_i32_0 : i32, i32
  }
  func.func @transform_8(%arg0: i32) -> (i32, i32) {
    %c0_i32 = arith.constant 0 : i32
    %c0_i32_0 = arith.constant 0 : i32
    %c0_i32_1 = arith.constant 0 : i32
    return %c0_i32, %c0_i32_0 : i32, i32
  }
  func.func @transform_9(%arg0: i32) -> (i32, i32) {
    %c0_i32 = arith.constant 0 : i32
    %c0_i32_0 = arith.constant 0 : i32
    return %arg0, %c0_i32 : i32, i32
  }
}

</mosaic_0001>

<bundles_post_ra>
// kernel: mlp_forward.1
= control target key start
LH: loop header
LB: loop body
LE: loop exit
PB: predicated region body
PF: predicated region fallthrough
CT: control target
= control target key end

     0   :  { %s1785_s0 = inlined_call_operand.vmem [shape: f32[8,784], index: 0, kind: input, shape index: {}]   ;;  %s1786_s1 = inlined_call_operand.vmem [shape: f32[784,128], index: 1, kind: input, shape index: {}]   ;;  %s1787_s2 = inlined_call_operand.vmem [shape: f32[1,128], index: 2, kind: input, shape index: {}]   ;;  %s1788_s3 = inlined_call_operand.vmem [shape: f32[128,128], index: 3, kind: input, shape index: {}]   ;;  %s1789_s4 = inlined_call_operand.vmem [shape: f32[1,128], index: 4, kind: input, shape index: {}]   ;;  %s1790_s5 = inlined_call_operand.vmem [shape: f32[128,128], index: 5, kind: input, shape index: {}]   ;;  %s1791_s6 = inlined_call_operand.vmem [shape: f32[1,128], index: 6, kind: input, shape index: {}]   ;;  %s1792_s7 = inlined_call_operand.vmem [shape: f32[128,128], index: 7, kind: input, shape index: {}]   ;;  %s1793_s8 = inlined_call_operand.vmem [shape: f32[1,128], index: 8, kind: input, shape index: {}]   ;;  %s1794_s9 = inlined_call_operand.hbm [shape: f32[8,128], index: 9, kind: output, shape index: {}]  }
   0x1   :  { %v56_v0 = vld [vmem:[%s1786_s1 + $0x80] sm:$0xff]  ;;  %v57_v1 = vld [vmem:[%s1786_s1 + $0x88] sm:$0xff]  ;;  %v58_v11 = vld [vmem:[%s1786_s1 + $0x90] sm:$0xff] }
   0x2   :  { %v40_v2 = vld [vmem:[%s1786_s1] sm:$0xff]  ;;  %v1012_v3 = vpack.c.bf16 %v57_v1, %v56_v0  ;;  %v41_v4 = vld [vmem:[%s1786_s1 + $0x8] sm:$0xff]  ;;  %v59_v13 = vld [vmem:[%s1786_s1 + $0x98] sm:$0xff] }
   0x3   :  { %v88_v5 = vld [vmem:[%s1786_s1 + $0x180] sm:$0xff]  ;;  %v89_v6 = vld [vmem:[%s1786_s1 + $0x188] sm:$0xff]  ;;  %v1014_v7 = vpack.c.bf16 %v41_v4, %v40_v2  ;;  %v42_v14 = vld [vmem:[%s1786_s1 + $0x10] sm:$0xff]  ;;  %v1016_v16 = vpack.c.bf16 %v59_v13, %v58_v11 }
   0x4   :  { %v1044_v8 = vpack.c.bf16 %v89_v6, %v88_v5  ;;  %v72_v9 = vld [vmem:[%s1786_s1 + $0x100] sm:$0xff]  ;;  %v73_v10 = vld [vmem:[%s1786_s1 + $0x108] sm:$0xff]  ;;  %1013 = vmatprep.subr.bf16.mxu0 %v1012_v3  ;;  %v43_v15 = vld [vmem:[%s1786_s1 + $0x18] sm:$0xff] }
   0x5   :  { %v1046_v12 = vpack.c.bf16 %v73_v10, %v72_v9  ;;  %1015 = vmatpush3.bf16.msra.mxu0 %v1014_v7  ;;  %v1018_v17 = vpack.c.bf16 %v43_v15, %v42_v14  ;;  %v90_v18 = vld [vmem:[%s1786_s1 + $0x190] sm:$0xff]  ;;  %v91_v19 = vld [vmem:[%s1786_s1 + $0x198] sm:$0xff]  ;;  %v60_v23 = vld [vmem:[%s1786_s1 + $0xa0] sm:$0xff] }
   0x6   :  { %1045 = vmatprep.subr.bf16.mxu1 %v1044_v8  ;;  %v74_v20 = vld [vmem:[%s1786_s1 + $0x110] sm:$0xff]  ;;  %v1048_v21 = vpack.c.bf16 %v91_v19, %v90_v18  ;;  %v75_v22 = vld [vmem:[%s1786_s1 + $0x118] sm:$0xff]  ;;  %v61_v24 = vld [vmem:[%s1786_s1 + $0xa8] sm:$0xff]  ;;  %1017 = vmatprep.subr.bf16.mxu0 %v1016_v16 }
   0x7   :  { %1047 = vmatpush3.bf16.msra.mxu1 %v1046_v12  ;;  %v1050_v25 = vpack.c.bf16 %v75_v22, %v74_v20  ;;  %v1020_v26 = vpack.c.bf16 %v61_v24, %v60_v23  ;;  %v44_v27 = vld [vmem:[%s1786_s1 + $0x20] sm:$0xff]  ;;  %v45_v28 = vld [vmem:[%s1786_s1 + $0x28] sm:$0xff]  ;;  %v62_v35 = vld [vmem:[%s1786_s1 + $0xb0] sm:$0xff] }
   0x8   :  { %v92_v29 = vld [vmem:[%s1786_s1 + $0x1a0] sm:$0xff]  ;;  %1049 = vmatprep.subr.bf16.mxu1 %v1048_v21  ;;  %v93_v30 = vld [vmem:[%s1786_s1 + $0x1a8] sm:$0xff]  ;;  %v1022_v33 = vpack.c.bf16 %v45_v28, %v44_v27  ;;  %v63_v36 = vld [vmem:[%s1786_s1 + $0xb8] sm:$0xff] }
   0x9   :  { %v76_v31 = vld [vmem:[%s1786_s1 + $0x120] sm:$0xff]  ;;  %v77_v32 = vld [vmem:[%s1786_s1 + $0x128] sm:$0xff]  ;;  %1019 = vmatpush3.bf16.msra.mxu0 %v1018_v17  ;;  %v1052_v34 = vpack.c.bf16 %v93_v30, %v92_v29  ;;  %v46_v37 = vld [vmem:[%s1786_s1 + $0x30] sm:$0xff]  ;;  %v1024_v39 = vpack.c.bf16 %v63_v36, %v62_v35 }
   0xa   :  { %1021 = vmatprep.subr.bf16.mxu0 %v1020_v26  ;;  %v1054_v38 = vpack.c.bf16 %v77_v32, %v76_v31  ;;  %v47_v40 = vld [vmem:[%s1786_s1 + $0x38] sm:$0xff]  ;;  %v94_v41 = vld [vmem:[%s1786_s1 + $0x1b0] sm:$0xff]  ;;  %v64_v46 = vld [vmem:[%s1786_s1 + $0xc0] sm:$0xff] }
   0xb   :  { %1051 = vmatpush3.bf16.msra.mxu1 %v1050_v25  ;;  %v95_v42 = vld [vmem:[%s1786_s1 + $0x1b8] sm:$0xff]  ;;  %v78_v44 = vld [vmem:[%s1786_s1 + $0x130] sm:$0xff]  ;;  %v65_v47 = vld [vmem:[%s1786_s1 + $0xc8] sm:$0xff]  ;;  %v1026_v48 = vpack.c.bf16 %v47_v40, %v46_v37 }
   0xc   :  { %1053 = vmatprep.subr.bf16.mxu1 %v1052_v34  ;;  %v1056_v43 = vpack.c.bf16 %v95_v42, %v94_v41  ;;  %v79_v45 = vld [vmem:[%s1786_s1 + $0x138] sm:$0xff]  ;;  %v96_v49 = vld [vmem:[%s1786_s1 + $0x1c0] sm:$0xff]  ;;  %v97_v50 = vld [vmem:[%s1786_s1 + $0x1c8] sm:$0xff]  ;;  %v1028_v52 = vpack.c.bf16 %v65_v47, %v64_v46 }
   0xd   :  { %1023 = vmatpush3.bf16.msra.mxu0 %v1022_v33  ;;  %v1058_v51 = vpack.c.bf16 %v79_v45, %v78_v44  ;;  %v48_v53 = vld [vmem:[%s1786_s1 + $0x40] sm:$0xff]  ;;  %v49_v54 = vld [vmem:[%s1786_s1 + $0x48] sm:$0xff]  ;;  %v1060_v56 = vpack.c.bf16 %v97_v50, %v96_v49  ;;  %v66_v58 = vld [vmem:[%s1786_s1 + $0xd0] sm:$0xff]  ;;  %v1215_v50 = vmov 0.0|0.0  }
   0xe   :  { %1025 = vmatprep.subr.bf16.mxu0 %v1024_v39  ;;  %v80_v55 = vld [vmem:[%s1786_s1 + $0x140] sm:$0xff]  ;;  %v81_v57 = vld [vmem:[%s1786_s1 + $0x148] sm:$0xff]  ;;  %v67_v59 = vld [vmem:[%s1786_s1 + $0xd8] sm:$0xff]  ;;  %v1030_v62 = vpack.c.bf16 %v49_v54, %v48_v53 }
   0xf   :  { %1055 = vmatpush3.bf16.msra.mxu1 %v1054_v38  ;;  %v98_v60 = vld [vmem:[%s1786_s1 + $0x1d0] sm:$0xff]  ;;  %v99_v61 = vld [vmem:[%s1786_s1 + $0x1d8] sm:$0xff]  ;;  %v1062_v63 = vpack.c.bf16 %v81_v57, %v80_v55  ;;  %v1032_v0 = vpack.c.bf16 %v67_v59, %v66_v58  ;;  %v68_v6 = vld [vmem:[%s1786_s1 + $0xe0] sm:$0xff] }
  0x10   :  { %1057 = vmatprep.subr.bf16.mxu1 %v1056_v43  ;;  %v50_v1 = vld [vmem:[%s1786_s1 + $0x50] sm:$0xff]  ;;  %v51_v2 = vld [vmem:[%s1786_s1 + $0x58] sm:$0xff]  ;;  %v1064_v4 = vpack.c.bf16 %v99_v61, %v98_v60  ;;  %v69_v7 = vld [vmem:[%s1786_s1 + $0xe8] sm:$0xff] }
  0x11   :  { %1027 = vmatpush3.bf16.msra.mxu0 %v1026_v48  ;;  %v82_v3 = vld [vmem:[%s1786_s1 + $0x150] sm:$0xff]  ;;  %v83_v5 = vld [vmem:[%s1786_s1 + $0x158] sm:$0xff]  ;;  %v100_v8 = vld [vmem:[%s1786_s1 + $0x1e0] sm:$0xff]  ;;  %v1034_v10 = vpack.c.bf16 %v51_v2, %v50_v1  ;;  %v1036_v14 = vpack.c.bf16 %v69_v7, %v68_v6 }
  0x12   :  { %1029 = vmatprep.subr.bf16.mxu0 %v1028_v52  ;;  %v101_v9 = vld [vmem:[%s1786_s1 + $0x1e8] sm:$0xff]  ;;  %v52_v11 = vld [vmem:[%s1786_s1 + $0x60] sm:$0xff]  ;;  %v1066_v13 = vpack.c.bf16 %v83_v5, %v82_v3  ;;  %v70_v19 = vld [vmem:[%s1786_s1 + $0xf0] sm:$0xff] }
  0x13   :  { %1059 = vmatpush3.bf16.msra.mxu1 %v1058_v51  ;;  %v34_v12 = vld [vmem:[%s1785_s0 + $0x8] sm:$0xff]  ;;  %v84_v16 = vld [vmem:[%s1786_s1 + $0x160] sm:$0xff]  ;;  %v1068_v18 = vpack.c.bf16 %v101_v9, %v100_v8  ;;  %v71_v20 = vld [vmem:[%s1786_s1 + $0xf8] sm:$0xff] }
  0x14   :  { %1061 = vmatprep.subr.bf16.mxu1 %v1060_v56  ;;  %v53_v15 = vld [vmem:[%s1786_s1 + $0x68] sm:$0xff]  ;;  %213 = vmatprep.mubr.f32.mxu0 %v34_v12  ;;  %v36_v21 = vld [vmem:[%s1785_s0 + $0x18] sm:$0xff]  ;;  %v102_v22 = vld [vmem:[%s1786_s1 + $0x1f0] sm:$0xff]  ;;  %v1040_v26 = vpack.c.bf16 %v71_v20, %v70_v19 }
  0x15   :  { %1031 = vmatpush3.bf16.msra.mxu0 %v1030_v62  ;;  %v85_v17 = vld [vmem:[%s1786_s1 + $0x168] sm:$0xff]  ;;  %v103_v23 = vld [vmem:[%s1786_s1 + $0x1f8] sm:$0xff]  ;;  %283 = vmatprep.mubr.f32.mxu1 %v36_v21  ;;  %v1038_v24 = vpack.c.bf16 %v53_v15, %v52_v11  ;;  %v54_v27 = vld [vmem:[%s1786_s1 + $0x70] sm:$0xff] }
  0x16   :  { %1033 = vmatprep.subr.bf16.mxu0 %v1032_v0  ;;  %v1070_v25 = vpack.c.bf16 %v85_v17, %v84_v16  ;;  %v55_v28 = vld [vmem:[%s1786_s1 + $0x78] sm:$0xff]  ;;  %v86_v29 = vld [vmem:[%s1786_s1 + $0x170] sm:$0xff]  ;;  %v1072_v30 = vpack.c.bf16 %v103_v23, %v102_v22  ;;  %v120_v32 = vld [vmem:[%s1786_s1 + $0x280] sm:$0xff] }
  0x17   :  { %1063 = vmatpush3.bf16.msra.mxu1 %v1062_v63  ;;  %v87_v31 = vld [vmem:[%s1786_s1 + $0x178] sm:$0xff]  ;;  %v121_v33 = vld [vmem:[%s1786_s1 + $0x288] sm:$0xff]  ;;  %v1042_v34 = vpack.c.bf16 %v55_v28, %v54_v27  ;;  %v104_v37 = vld [vmem:[%s1786_s1 + $0x200] sm:$0xff] }
  0x18   :  { %1065 = vmatprep.subr.bf16.mxu1 %v1064_v4  ;;  %v1074_v35 = vpack.c.bf16 %v87_v31, %v86_v29  ;;  %v1076_v36 = vpack.c.bf16 %v121_v33, %v120_v32  ;;  %v105_v38 = vld [vmem:[%s1786_s1 + $0x208] sm:$0xff]  ;;  %v122_v39 = vld [vmem:[%s1786_s1 + $0x290] sm:$0xff]  ;;  %v123_v40 = vld [vmem:[%s1786_s1 + $0x298] sm:$0xff] }
  0x19   :  { %1035 = vmatpush3.bf16.msra.mxu0 %v1034_v10  ;;  %v33_v41 = vld [vmem:[%s1785_s0] sm:$0xff]  ;;  %v1078_v42 = vpack.c.bf16 %v105_v38, %v104_v37  ;;  %v35_v43 = vld [vmem:[%s1785_s0 + $0x10] sm:$0xff]  ;;  %v1080_v45 = vpack.c.bf16 %v123_v40, %v122_v39  ;;  %v107_v46 = vld [vmem:[%s1786_s1 + $0x218] sm:$0xff] }
  0x1a   :  { %1037 = vmatprep.subr.bf16.mxu0 %v1036_v14  ;;  %v106_v44 = vld [vmem:[%s1786_s1 + $0x210] sm:$0xff]  ;;  %v124_v47 = vld [vmem:[%s1786_s1 + $0x2a0] sm:$0xff]  ;;  %v125_v48 = vld [vmem:[%s1786_s1 + $0x2a8] sm:$0xff] }
  0x1b   :  { %1067 = vmatpush3.bf16.msra.mxu1 %v1066_v13  ;;  %v38_v49 = vld [vmem:[%s1785_s0 + $0x28] sm:$0xff]  ;;  %v136_v51 = vld [vmem:[%s1786_s1 + $0x300] sm:$0xff] }
  0x1c   :  { %1069 = vmatprep.subr.bf16.mxu1 %v1068_v18  ;;  %v137_v52 = vld [vmem:[%s1786_s1 + $0x308] sm:$0xff] }
  0x1d   :  { %1039 = vmatpush3.bf16.msra.mxu0 %v1038_v24  ;;  %v1109_v53 = vpack.c.bf16 %v137_v52, %v136_v51 }
  0x1e   :  { %1041 = vmatprep.subr.bf16.mxu0 %v1040_v26 }
  0x1f   :  { %1071 = vmatpush3.bf16.msra.mxu1 %v1070_v25 }
  0x20   :  { %1073 = vmatprep.subr.bf16.mxu1 %v1072_v30 }
  0x21   :  { %1043 = vmatpush3.bf16.msra.mxu0 %v1042_v34 }
  0x22   :  { %1077 = vmatprep.subr.bf16.mxu0 %v1076_v36 }
  0x23   :  { %1075 = vmatpush3.bf16.msra.mxu1 %v1074_v35 }
  0x24   :  { %1108 = vmatprep.subr.bf16.mxu1 %v1215_v50  ;;  %214 = vmatmul.mubr.f32.vlgmr.msra.gmra.mrb[0].mxu0 %v33_v41 }
  0x25   :  { %14 = vsyncpa [#allocation3], 0  ;;  %1079 = vmatpush3.bf16.msra.mxu0 %v1078_v42  ;;  %v1082_v54 = vpack.c.bf16 %v107_v46, %v106_v44  ;;  %v1084_v55 = vpack.c.bf16 %v125_v48, %v124_v47  ;;  %v108_v56 = vld [vmem:[%s1786_s1 + $0x220] sm:$0xff]  ;;  %v109_v57 = vld [vmem:[%s1786_s1 + $0x228] sm:$0xff]  ;;  %353 = vmatprep.mubr.f32.mxu0 %v38_v49  ;;  %vm1216_vm0 = vmmov 0   ;;  %v1217_v60 = vmov 0.0  }
  0x26   :  { %284 = vmatmul.mubr.f32.vlgmr.msra.gmra.mrb[0].mxu1 %v35_v43  ;;  %1081 = vmatprep.subr.bf16.mxu0 %v1080_v45  ;;  %v126_v58 = vld [vmem:[%s1786_s1 + $0x2b0] sm:$0xff]  ;;  %v127_v59 = vld [vmem:[%s1786_s1 + $0x2b8] sm:$0xff]  ;;  %vm145_vm1 = vcmask 130048   ;;  %v1086_v62 = vpack.c.bf16 %v109_v57, %v108_v56  ;;  %v128_v2 = vld [vmem:[%s1786_s1 + $0x2c0] sm:$0xff] }
  0x27   :  { %1110 = vmatpush3.bf16.msra.mxu1 %v1109_v53  ;;  %904 = vmatprep.mubr.msk.f32.mxu1 %vm1216_vm0, %v1217_v60  ;;  %v39_v61 = vld [vmem:[%s1785_s0 + $0x30] sm:$0xff]  ;;  %v1088_v63 = vpack.c.bf16 %v127_v59, %v126_v58  ;;  %v111_v1 = vld [vmem:[%s1786_s1 + $0x238] sm:$0xff]  ;;  %v129_v3 = vld [vmem:[%s1786_s1 + $0x2c8] sm:$0xff] }
  0x28   :  { %1111 = vmatprep.subr.bf16.mxu1 %v1215_v50  ;;  %v110_v0 = vld [vmem:[%s1786_s1 + $0x230] sm:$0xff]  ;;  %v1092_v5 = vpack.c.bf16 %v129_v3, %v128_v2  ;;  %v112_v6 = vld [vmem:[%s1786_s1 + $0x240] sm:$0xff]  ;;  %v113_v7 = vld [vmem:[%s1786_s1 + $0x248] sm:$0xff] }
  0x29   :  { %1083 = vmatpush3.bf16.msra.mxu0 %v1082_v54  ;;  %v1090_v4 = vpack.c.bf16 %v111_v1, %v110_v0  ;;  %v130_v8 = vld [vmem:[%s1786_s1 + $0x2d0] sm:$0xff]  ;;  %v131_v9 = vld [vmem:[%s1786_s1 + $0x2d8] sm:$0xff]  ;;  %v1094_v10 = vpack.c.bf16 %v113_v7, %v112_v6  ;;  %v132_v14 = vld [vmem:[%s1786_s1 + $0x2e0] sm:$0xff] }
  0x2a   :  { %1085 = vmatprep.subr.bf16.mxu0 %v1084_v55  ;;  %905 = vmatmul.mubr.msk.f32.vlgmr.msra.gmra.mrb[2].mxu1 %vm145_vm1, %v39_v61  ;;  %v1096_v11 = vpack.c.bf16 %v131_v9, %v130_v8  ;;  %v114_v12 = vld [vmem:[%s1786_s1 + $0x250] sm:$0xff]  ;;  %v115_v13 = vld [vmem:[%s1786_s1 + $0x258] sm:$0xff]  ;;  %v133_v15 = vld [vmem:[%s1786_s1 + $0x2e8] sm:$0xff] }
  0x2b   :  { %939 = vmatprep.mubr.msk.f32.mxu1 %vm1216_vm0, %v1217_v60  ;;  %v1098_v16 = vpack.c.bf16 %v115_v13, %v114_v12  ;;  %v1100_v17 = vpack.c.bf16 %v133_v15, %v132_v14  ;;  %v116_v18 = vld [vmem:[%s1786_s1 + $0x260] sm:$0xff]  ;;  %v117_v19 = vld [vmem:[%s1786_s1 + $0x268] sm:$0xff]  ;;  %v134_v20 = vld [vmem:[%s1786_s1 + $0x2f0] sm:$0xff] }
  0x2c   :  { %v135_v21 = vld [vmem:[%s1786_s1 + $0x2f8] sm:$0xff]  ;;  %v1102_v22 = vpack.c.bf16 %v117_v19, %v116_v18  ;;  %v118_v24 = vld [vmem:[%s1786_s1 + $0x270] sm:$0xff]  ;;  %v37_v27 = vld [vmem:[%s1785_s0 + $0x20] sm:$0xff] }
  0x2d   :  { %1087 = vmatpush3.bf16.msra.mxu0 %v1086_v62  ;;  %v1104_v23 = vpack.c.bf16 %v135_v21, %v134_v20  ;;  %v119_v25 = vld [vmem:[%s1786_s1 + $0x278] sm:$0xff]  ;;  %v430_v28 = vld [vmem:[%s1788_s3] sm:$0xff]  ;;  %v431_v29 = vld [vmem:[%s1788_s3 + $0x8] sm:$0xff] }
  0x2e   :  { %1089 = vmatprep.subr.bf16.mxu0 %v1088_v63  ;;  %v1106_v26 = vpack.c.bf16 %v119_v25, %v118_v24  ;;  %v432_v30 = vld [vmem:[%s1788_s3 + $0x10] sm:$0xff]  ;;  %v1112_v31 = vpack.c.bf16 %v431_v29, %v430_v28  ;;  %v433_v32 = vld [vmem:[%s1788_s3 + $0x18] sm:$0xff]  ;;  %v434_v34 = vld [vmem:[%s1788_s3 + $0x20] sm:$0xff] }
  0x2f   :  { %v1115_v33 = vpack.c.bf16 %v433_v32, %v432_v30  ;;  %v435_v35 = vld [vmem:[%s1788_s3 + $0x28] sm:$0xff]  ;;  %v436_v37 = vld [vmem:[%s1788_s3 + $0x30] sm:$0xff]  ;;  %v437_v38 = vld [vmem:[%s1788_s3 + $0x38] sm:$0xff] }
  0x30   :  { %1113 = vmatpush3.bf16.msra.mxu1 %v1112_v31  ;;  %v1118_v36 = vpack.c.bf16 %v435_v35, %v434_v34  ;;  %v1121_v39 = vpack.c.bf16 %v437_v38, %v436_v37  ;;  %v438_v40 = vld [vmem:[%s1788_s3 + $0x40] sm:$0xff]  ;;  %v439_v41 = vld [vmem:[%s1788_s3 + $0x48] sm:$0xff]  ;;  %v440_v43 = vld [vmem:[%s1788_s3 + $0x50] sm:$0xff] }
  0x31   :  { %1091 = vmatpush3.bf16.msra.mxu0 %v1090_v4  ;;  %1114 = vmatprep.subr.bf16.mxu1 %v1215_v50  ;;  %v1124_v42 = vpack.c.bf16 %v439_v41, %v438_v40  ;;  %v441_v44 = vld [vmem:[%s1788_s3 + $0x58] sm:$0xff]  ;;  %v442_v46 = vld [vmem:[%s1788_s3 + $0x60] sm:$0xff]  ;;  %v443_v47 = vld [vmem:[%s1788_s3 + $0x68] sm:$0xff] }
  0x32   :  { %1093 = vmatprep.subr.bf16.mxu0 %v1092_v5  ;;  %v1127_v45 = vpack.c.bf16 %v441_v44, %v440_v43  ;;  %v1130_v48 = vpack.c.bf16 %v443_v47, %v442_v46  ;;  %v444_v49 = vld [vmem:[%s1788_s3 + $0x70] sm:$0xff]  ;;  %v445_v51 = vld [vmem:[%s1788_s3 + $0x78] sm:$0xff]  ;;  %v524_v53 = vld [vmem:[%s1790_s5] sm:$0xff] }
  0x33   :  { %v1133_v52 = vpack.c.bf16 %v445_v51, %v444_v49  ;;  %v525_v54 = vld [vmem:[%s1790_s5 + $0x8] sm:$0xff]  ;;  %v526_v55 = vld [vmem:[%s1790_s5 + $0x10] sm:$0xff]  ;;  %v527_v57 = vld [vmem:[%s1790_s5 + $0x18] sm:$0xff] }
  0x34   :  { %1116 = vmatpush3.bf16.msra.mxu1 %v1115_v33  ;;  %v1136_v56 = vpack.c.bf16 %v525_v54, %v524_v53  ;;  %v1139_v58 = vpack.c.bf16 %v527_v57, %v526_v55  ;;  %v528_v59 = vld [vmem:[%s1790_s5 + $0x20] sm:$0xff]  ;;  %v529_v61 = vld [vmem:[%s1790_s5 + $0x28] sm:$0xff]  ;;  %v530_v63 = vld [vmem:[%s1790_s5 + $0x30] sm:$0xff] }
  0x35   :  { %1095 = vmatpush3.bf16.msra.mxu0 %v1094_v10  ;;  %1117 = vmatprep.subr.bf16.mxu1 %v1215_v50  ;;  %v1142_v62 = vpack.c.bf16 %v529_v61, %v528_v59  ;;  %v531_v0 = vld [vmem:[%s1790_s5 + $0x38] sm:$0xff]  ;;  %v532_v2 = vld [vmem:[%s1790_s5 + $0x40] sm:$0xff]  ;;  %v533_v3 = vld [vmem:[%s1790_s5 + $0x48] sm:$0xff] }
  0x36   :  { %1097 = vmatprep.subr.bf16.mxu0 %v1096_v11  ;;  %v1145_v1 = vpack.c.bf16 %v531_v0, %v530_v63  ;;  %v1148_v4 = vpack.c.bf16 %v533_v3, %v532_v2  ;;  %v534_v5 = vld [vmem:[%s1790_s5 + $0x50] sm:$0xff]  ;;  %v535_v6 = vld [vmem:[%s1790_s5 + $0x58] sm:$0xff]  ;;  %v536_v8 = vld [vmem:[%s1790_s5 + $0x60] sm:$0xff] }
  0x37   :  { %v1151_v7 = vpack.c.bf16 %v535_v6, %v534_v5  ;;  %v537_v9 = vld [vmem:[%s1790_s5 + $0x68] sm:$0xff]  ;;  %v736_v12 = vld [vmem:[%s1787_s2] ss:$0 sm:$0xff]  ;;  %v538_v28 = vld [vmem:[%s1790_s5 + $0x70] sm:$0xff] }
  0x38   :  { %1119 = vmatpush3.bf16.msra.mxu1 %v1118_v36  ;;  %v1154_v10 = vpack.c.bf16 %v537_v9, %v536_v8  ;;  %v539_v29 = vld [vmem:[%s1790_s5 + $0x78] sm:$0xff]  ;;  %v618_v31 = vld [vmem:[%s1792_s7] sm:$0xff]  ;;  %v619_v32 = vld [vmem:[%s1792_s7 + $0x8] sm:$0xff] }
  0x39   :  { %1099 = vmatpush3.bf16.msra.mxu0 %v1098_v16  ;;  %1120 = vmatprep.subr.bf16.mxu1 %v1215_v50  ;;  %v1157_v30 = vpack.c.bf16 %v539_v29, %v538_v28  ;;  %v1160_v33 = vpack.c.bf16 %v619_v32, %v618_v31  ;;  %v621_v34 = vld [vmem:[%s1792_s7 + $0x18] sm:$0xff]  ;;  %v622_v36 = vld [vmem:[%s1792_s7 + $0x20] sm:$0xff]  ;;  %v623_v37 = vld [vmem:[%s1792_s7 + $0x28] sm:$0xff] }
  0x3a   :  { %1101 = vmatprep.subr.bf16.mxu0 %v1100_v17  ;;  %v1166_v38 = vpack.c.bf16 %v623_v37, %v622_v36  ;;  %v625_v40 = vld [vmem:[%s1792_s7 + $0x38] sm:$0xff]  ;;  %v627_v43 = vld [vmem:[%s1792_s7 + $0x48] sm:$0xff]  ;;  %v632_v57 = vld [vmem:[%s1792_s7 + $0x70] sm:$0xff] }
  0x3b   :  { %v629_v46 = vld [vmem:[%s1792_s7 + $0x58] sm:$0xff]  ;;  %v631_v49 = vld [vmem:[%s1792_s7 + $0x68] sm:$0xff] }
  0x3c   :  { %1122 = vmatpush3.bf16.msra.mxu1 %v1121_v39  ;;  %v624_v39 = vld [vmem:[%s1792_s7 + $0x30] sm:$0xff] }
  0x3d   :  { %1103 = vmatpush3.bf16.msra.mxu0 %v1102_v22  ;;  %1123 = vmatprep.subr.bf16.mxu1 %v1215_v50  ;;  %v1169_v41 = vpack.c.bf16 %v625_v40, %v624_v39 }
  0x3e   :  { %1105 = vmatprep.subr.bf16.mxu0 %v1104_v23 }
  0x40   :  { %1125 = vmatpush3.bf16.msra.mxu1 %v1124_v42  ;;  %v626_v42 = vld [vmem:[%s1792_s7 + $0x40] sm:$0xff] }
  0x41   :  { %1107 = vmatpush3.bf16.msra.mxu0 %v1106_v26  ;;  %1126 = vmatprep.subr.bf16.mxu1 %v1215_v50  ;;  %v1172_v44 = vpack.c.bf16 %v627_v43, %v626_v42 }
  0x42   :  { %1135 = vmatprep.subr.bf16.mxu0 %v1215_v50 }
  0x44   :  { %354 = vmatmul.mubr.f32.vlgmr.msra.gmra.mrb[2].mxu0 %v37_v27  ;;  %1128 = vmatpush3.bf16.msra.mxu1 %v1127_v45  ;;  %v628_v45 = vld [vmem:[%s1792_s7 + $0x50] sm:$0xff] }
  0x45   :  { %974 = vmatprep.mubr.msk.f32.mxu0 %vm1216_vm0, %v1217_v60  ;;  %1129 = vmatprep.subr.bf16.mxu1 %v1215_v50  ;;  %v1175_v47 = vpack.c.bf16 %v629_v46, %v628_v45 }
  0x46   :  { %1137 = vmatpush3.bf16.msra.mxu0 %v1136_v56 }
  0x47   :  { %1138 = vmatprep.subr.bf16.mxu0 %v1215_v50 }
  0x48   :  { %1131 = vmatpush3.bf16.msra.mxu1 %v1130_v48  ;;  %v630_v48 = vld [vmem:[%s1792_s7 + $0x60] sm:$0xff] }
  0x49   :  { %1132 = vmatprep.subr.bf16.mxu1 %v1215_v50  ;;  %v1178_v51 = vpack.c.bf16 %v631_v49, %v630_v48 }
  0x4a   :  { %1140 = vmatpush3.bf16.msra.mxu0 %v1139_v58  ;;  %v633_v58 = vld [vmem:[%s1792_s7 + $0x78] sm:$0xff] }
  0x4b   :  { %1141 = vmatprep.subr.bf16.mxu0 %v1215_v50  ;;  %v1181_v59 = vpack.c.bf16 %v633_v58, %v632_v57 }
  0x4c   :  { %1134 = vmatpush3.bf16.msra.mxu1 %v1133_v52  ;;  %v738_v52 = vld [vmem:[%s1789_s4] ss:$0 sm:$0xff] }
  0x4d   :  { %1159 = vmatprep.subr.bf16.mxu1 %v1215_v50 }
  0x4e   :  { %1143 = vmatpush3.bf16.msra.mxu0 %v1142_v62 }
  0x4f   :  { %1144 = vmatprep.subr.bf16.mxu0 %v1215_v50 }
  0x52   :  { %1146 = vmatpush3.bf16.msra.mxu0 %v1145_v1  ;;  %v740_v1 = vld [vmem:[%s1793_s8] ss:$0 sm:$0xff] }
  0x53   :  { %1147 = vmatprep.subr.bf16.mxu0 %v1215_v50 }
  0x56   :  { %1149 = vmatpush3.bf16.msra.mxu0 %v1148_v4 }
  0x57   :  { %1150 = vmatprep.subr.bf16.mxu0 %v1215_v50 }
  0x5a   :  { %1152 = vmatpush3.bf16.msra.mxu0 %v1151_v7 }
  0x5b   :  { %1153 = vmatprep.subr.bf16.mxu0 %v1215_v50 }
  0x5e   :  { %1155 = vmatpush3.bf16.msra.mxu0 %v1154_v10 }
  0x5f   :  { %1156 = vmatprep.subr.bf16.mxu0 %v1215_v50 }
  0x62   :  { %1158 = vmatpush3.bf16.msra.mxu0 %v1157_v30 }
  0xf7   :  { %v773_v11 = vpop.f32.mrb[0].mxu0 }
  0xf8   :  { %v774_v13 = vpop.f32.mrb[1].mxu0 }
  0xf9   :  { %v808_v14 = vpop.f32.mrb[0].mxu1  ;;  %v775_v15 = vadd.f32 %v774_v13, %v773_v11 }
  0xfa   :  { %v809_v16 = vpop.f32.mrb[1].mxu1 }
  0xfb   :  { %v810_v17 = vadd.f32 %v809_v16, %v808_v14  ;;  %v216_v18 = vadd.f32 %v775_v15, %v736_v12 }
  0xfd   :  { %v286_v19 = vadd.f32 %v810_v17, %v216_v18  ;;  %v425_v20 = vpop.f32.mrb[2].mxu1 }
  0xfe   :  { %v906_v21 = vpop.f32.mrb[3].mxu1 }
 0x117   :  { %v843_v22 = vpop.f32.mrb[2].mxu0 }
 0x118   :  { %v844_v23 = vpop.f32.mrb[3].mxu0 }
 0x119   :  { %v845_v24 = vadd.f32 %v844_v23, %v843_v22 }
 0x11b   :  { %v356_v25 = vadd.f32 %v845_v24, %v286_v19 }
 0x11d   :  { %v426_v26 = vadd.f32 %v425_v20, %v356_v25 }
 0x11f   :  { %v429_v27 = vmax.f32 %v426_v26, 0.0 }
 0x121   :  { %940 = vmatmul.mubr.f32.vlgmr.msra.gmra.mrb[4].mxu1 %v429_v27 }
 0x122   :  { %1009 = vmatprep.mubr.msk.f32.mxu1 %vm1216_vm0, %v1217_v60  ;;  %v620_v60 = vld [vmem:[%s1792_s7 + $0x10] sm:$0xff]  ;;  %1161 = vmatpush3.bf16.msra.mxu1 %v1160_v33 }
 0x123   :  { %v1163_v35 = vpack.c.bf16 %v621_v34, %v620_v60  ;;  %1162 = vmatprep.subr.bf16.mxu1 %v1215_v50 }
 0x126   :  { %1164 = vmatpush3.bf16.msra.mxu1 %v1163_v35 }
 0x127   :  { %1165 = vmatprep.subr.bf16.mxu1 %v1215_v50 }
 0x12a   :  { %1167 = vmatpush3.bf16.msra.mxu1 %v1166_v38 }
 0x12b   :  { %1168 = vmatprep.subr.bf16.mxu1 %v1215_v50 }
 0x12e   :  { %1170 = vmatpush3.bf16.msra.mxu1 %v1169_v41 }
 0x12f   :  { %1171 = vmatprep.subr.bf16.mxu1 %v1215_v50 }
 0x132   :  { %1173 = vmatpush3.bf16.msra.mxu1 %v1172_v44 }
 0x133   :  { %1174 = vmatprep.subr.bf16.mxu1 %v1215_v50 }
 0x136   :  { %1176 = vmatpush3.bf16.msra.mxu1 %v1175_v47 }
 0x137   :  { %1177 = vmatprep.subr.bf16.mxu1 %v1215_v50 }
 0x13a   :  { %1179 = vmatpush3.bf16.msra.mxu1 %v1178_v51 }
 0x13b   :  { %1180 = vmatprep.subr.bf16.mxu1 %v1215_v50  ;;  %v739_v50 = vld [vmem:[%s1791_s6] ss:$0 sm:$0xff]  ;;  %s1218_s6 = smov [#allocation2]  }
 0x13c   :  { %s728_s7 = sshll.u32 %s1218_s6, 4  ;;  %s729_s7 = int_to_ptr.vmem [resolvable:$true] %s728_s7 }
 0x13d   :  { %s1191_s8 = scalar_lea.vmem %s729_s7, 128  ;;  %p1196_p1 = scmp.lt.s32.totalorder %s729_s7, %s729_s7 }
 0x13e   :  { %1182 = vmatpush3.bf16.msra.mxu1 %v1181_v59  ;;  %p1192_p0 = scmp.ne.s32.totalorder %s729_s7, %s1191_s8  ;;  %p1197_p2 = scmp.lt.s32.totalorder %s1191_s8, %s1191_s8 }
 0x140   :  { %p1198_p3 = por %p1197_p2, %p1196_p1 }
 0x142   :  { %p1199_p4 = pnand %p1198_p3, %p1192_p0 }
 0x1f4   :  { %v519_v53 = vpop.f32.mrb[4].mxu1 }
 0x1f5   :  { %v520_v54 = vadd.f32 %v738_v52, %v519_v53  ;;  %v941_v55 = vpop.f32.mrb[5].mxu1 }
 0x1f7   :  { %v523_v56 = vmax.f32 %v520_v54, 0.0 }
 0x1f9   :  { %975 = vmatmul.mubr.f32.vlgmr.msra.gmra.mrb[4].mxu0 %v523_v56 }
 0x2cc   :  { %v613_v61 = vpop.f32.mrb[4].mxu0 }
 0x2cd   :  { %v614_v62 = vadd.f32 %v739_v50, %v613_v61  ;;  %v976_v63 = vpop.f32.mrb[5].mxu0 }
 0x2cf   :  { %v617_v0 = vmax.f32 %v614_v62, 0.0 }
 0x2d1   :  { %1010 = vmatmul.mubr.f32.vlgmr.msra.gmra.mrb[6].mxu1 %v617_v0 }
 0x3a4   :  { %v707_v2 = vpop.f32.mrb[6].mxu1 }
 0x3a5   :  { %v708_v3 = vadd.f32 %v740_v1, %v707_v2  ;;  %v1011_v4 = vpop.f32.mrb[7].mxu1 }
 0x3a7   :  { %711 = vmax.xlane.f32.xlu0 %v708_v3 }
 0x434   :  { %v712_v5 = vpop.xlane.xlu0 %711 }
 0x435   :  { %v713_v6 = vsub.f32 %v708_v3, %v712_v5 }
 0x437   :  { %v714_v7 = vmul.f32 1.442695, %v713_v6 }
 0x439   :  { %1187 = vpow2.f32 %v714_v7 }
 0x443   :  { %v1188_v8 = vpop.eup %1187 }
 0x444   :  { %716 = vadd.xlane.f32.xlu0 %v1188_v8 }
 0x4d1   :  { %v717_v9 = vpop.xlane.xlu0 %716 }
 0x4d2   :  { %1189 = vlog2.f32 %v717_v9 }
 0x4dc   :  { %v1190_v10 = vpop.eup %1189 }
 0x4dd   :  { %v719_v11 = vmul.f32 0.6931472, %v1190_v10 }
 0x4df   :  { %v720_v12 = vsub.f32 %v713_v6, %v719_v11 }
 0x4e1   :  { %721 = vst [vmem:[#allocation2] sm:$0xff] %v720_v12 }
 0x4e2   :  { %1202 = shalt.err (!%p1199_p4)
}
 0x4e3   :  { %s1203_s0 = scalar_lea.hbm %s1794_s9, 128 }
 0x4e4   :  { %p1204_p5 = scmp.ne.s32.totalorder %s1794_s9, %s1203_s0  ;;  %p1207_p6 = scmp.lt.u32.totalorder %s1203_s0, %s1794_s9 }
 0x4e6   :  { %p1209_p7 = pnand %p1207_p6, %p1204_p5 }
 0x4e8   :  { %1212 = shalt.err (!%p1209_p7)
}
 0x4e9   :  { %731 = dma.vmem_to_hbm [thread:$0]  %s729_s7, 128, %s1794_s9, [#allocation3]  }
 0x4ea   :  { %1213 = dma.done.wait [#allocation3], 128  }
 0x4eb   :  { %1214 = vsyncadd [#allocation3], 4294967168 }
 0x4ec   :  { %735 = vsyncpa [#allocation3], 1 }

</bundles_post_ra>
